<compile_context>
chip_gen: v5e
topology: v5e:2x2
jax: 0.10.0
libtpu: 0.0.40
codegen_flags: <defaults>
</compile_context>

<pallas_src>
import jax
import jax.numpy as jnp
from jax.experimental import pallas as pl
from jax.experimental.pallas import tpu as pltpu

_LANE = 128
_MIN_STEPS = 8  # target minimum grid depth when the row count permits


def _h_swish_kernel(x_ref, o_ref):
    x = x_ref[...]
    # h_sigmoid(x) = relu6(x + 3) / 6 ; h_swish(x) = x * h_sigmoid(x)
    # (multiply by 1/6 instead of dividing; <=1-ulp difference, documented)
    hs = jnp.clip(x + 3.0, 0.0, 6.0) * (1.0 / 6.0)
    y = x * hs
    # Piecewise parity with PyTorch: hardswish(x) == 0 for x <= -3, including
    # x = -inf (where x * 0 would otherwise be NaN).
    y = jnp.where(x <= -3.0, jnp.zeros_like(y), y)
    o_ref[...] = y.astype(o_ref.dtype)


def _h_swish_jnp(x):
    hs = jnp.clip(x + 3.0, 0.0, 6.0) * (1.0 / 6.0)
    y = x * hs
    return jnp.where(x <= -3.0, jnp.zeros_like(y), y).astype(x.dtype)


def h_swish(x: jax.Array, *, target_block_bytes: int = 4 << 20,
            max_lane_width: int = 8192, jnp_fallback_bytes: int = 128 << 10,
            donate: bool = False) -> jax.Array:
    """Elementwise h_swish. Accepts any shape (e.g. NCHW), any float dtype."""
    orig_shape = x.shape
    total = x.size
    if total == 0:
        return x

    itemsize = jnp.dtype(x.dtype).itemsize
    nbytes = total * itemsize
    # Small tensors: pallas_call overhead dominates and the opaque custom call
    # blocks XLA fusion into producers/consumers.
    # Ragged tensors (total % 128 != 0): avoiding extra full-tensor pad/slice
    # HBM passes matters more than a hand-written kernel; XLA's elementwise op
    # is already one read + one write at roofline.
    if nbytes < jnp_fallback_bytes or (total % _LANE) != 0:
        return _h_swish_jnp(x).reshape(orig_shape)

    flat = x.reshape(-1)  # metadata-only for contiguous arrays

    # Lane-dense last dim: largest multiple of 128 dividing `total`, capped at
    # max_lane_width -> wide unmasked stores, fewer rows per block.
    C = _LANE
    w = (max_lane_width // _LANE) * _LANE
    while w >= _LANE:
        if total % w == 0:
            C = w
            break
        w -= _LANE
    R = total // C
    x2d = flat.reshape(R, C)

    sub = max(8, 32 // itemsize)  # sublane multiple: f32 8, bf16 16, i8 32

    # Block rows from the byte budget (~4 MiB per block, sublane aligned).
    tr = max(1, target_block_bytes // (C * itemsize))
    tr = max(sub, (tr // sub) * sub)
    # Enforce a minimum grid depth so the pipeline stays double-buffered and
    # both v7x TensorCores get >= 2 reasonably balanced blocks each.
    if R >= _MIN_STEPS * sub:
        tr = min(tr, max(sub, ((R // _MIN_STEPS) // sub) * sub))
    else:
        tr = min(tr, sub)
    if tr > R:
        tr = R  # full-dim block is always legal

    grid = (pl.cdiv(R, tr),)

    extra = {}
    if donate:
        # Caller guarantees x can be overwritten -> compute in place.
        extra["input_output_aliases"] = {0: 0}

    out2d = pl.pallas_call(
        _h_swish_kernel,
        out_shape=jax.ShapeDtypeStruct((R, C), x.dtype),
        grid_spec=pl.GridSpec(
            grid=grid,
            in_specs=[pl.BlockSpec((tr, C), lambda i: (i, 0))],
            out_specs=pl.BlockSpec((tr, C), lambda i: (i, 0)),
        ),
        compiler_params=pltpu.CompilerParams(
            dimension_semantics=("parallel",),
            vmem_limit_bytes=32 << 20,   # fits 4 MiB blocks x (2 in + 2 out) on v5e too
        ),
        **extra,
    )(x2d)

    return out2d.reshape(orig_shape)


if __name__ == "__main__":
    key = jax.random.PRNGKey(0)

    # 1) Small NCHW tensor (matches the PyTorch module's typical layout).
    #    Force the Pallas path (default policy would hand this to XLA).
    x = jax.random.normal(key, (2, 4, 16, 16), dtype=jnp.float32) * 3.0
    # Inject non-finite / boundary values to check piecewise parity.
    x = x.at[0, 0, 0, 0].set(-jnp.inf)
    x = x.at[0, 0, 0, 1].set(jnp.inf)
    x = x.at[0, 0, 0, 2].set(-3.0)
    out = jax.block_until_ready(h_swish(x, jnp_fallback_bytes=0))
    ref = _h_swish_jnp(x)
    assert out.shape == x.shape and out.dtype == x.dtype
    assert jnp.allclose(out, ref, atol=1e-6, rtol=1e-6), "mismatch (small NCHW)"
    assert float(out[0, 0, 0, 0]) == 0.0, "hardswish(-inf) must be 0"
    assert float(out[0, 0, 0, 2]) == 0.0, "hardswish(-3) must be 0"

    # 2) Larger aligned tensor: exercises the default (non-forced) kernel path
    #    and the min-grid-depth block sizing.
    x2 = jax.random.normal(jax.random.PRNGKey(1), (4, 32, 32, 32), dtype=jnp.float32) * 3.0
    out2 = jax.block_until_ready(h_swish(x2))
    ref2 = _h_swish_jnp(x2)
    assert out2.shape == x2.shape and out2.dtype == x2.dtype
    assert jnp.allclose(out2, ref2, atol=1e-6, rtol=1e-6), "mismatch (large aligned)"

    # 3) bf16 aligned tensor through the kernel (sublane multiple = 16).
    x3 = (jax.random.normal(jax.random.PRNGKey(2), (2, 8, 16, 16), dtype=jnp.float32) * 3.0
          ).astype(jnp.bfloat16)
    out3 = jax.block_until_ready(h_swish(x3, jnp_fallback_bytes=0))
    ref3 = _h_swish_jnp(x3)
    assert out3.shape == x3.shape and out3.dtype == x3.dtype
    assert jnp.allclose(out3.astype(jnp.float32), ref3.astype(jnp.float32),
                        atol=1e-2, rtol=1e-2), "mismatch (bf16)"

    # 4) Ragged shape (total % 128 != 0): handled by the fused XLA path.
    x4 = jax.random.normal(jax.random.PRNGKey(3), (3, 5, 7, 11), dtype=jnp.float32) * 3.0
    out4 = jax.block_until_ready(h_swish(x4))
    ref4 = _h_swish_jnp(x4)
    assert out4.shape == x4.shape and out4.dtype == x4.dtype
    assert jnp.allclose(out4, ref4, atol=1e-6, rtol=1e-6), "mismatch (ragged)"

    print("KERNEL_OK")
</pallas_src>

<mosaic_0001>
module attributes {stable_mosaic.version = 11 : i64} {
  func.func @_h_swish_kernel(%arg0: i32, %arg1: memref<1x2048xf32, #tpu.memory_space<vmem>>, %arg2: memref<1x2048xf32, #tpu.memory_space<vmem>>) attributes {dimension_semantics = [#tpu.dimension_semantics<parallel>], iteration_bounds = array<i64: 1>, scalar_prefetch = 0 : i64, scratch_operands = 0 : i64, tpu.core_type = #tpu.core_type<tc>, window_params = [{transform_indices = @transform_0, window_bounds = array<i64: 1, 2048>}, {transform_indices = @transform_1, window_bounds = array<i64: 1, 2048>}]} {
    %c0 = arith.constant 0 : index
    %c0_0 = arith.constant 0 : index
    %0 = vector.load %arg1[%c0, %c0_0] : memref<1x2048xf32, #tpu.memory_space<vmem>>, vector<1x2048xf32>
    %cst = arith.constant 3.000000e+00 : f32
    %1 = vector.broadcast %cst : f32 to vector<1x2048xf32>
    %2 = arith.addf %0, %1 : vector<1x2048xf32>
    %cst_1 = arith.constant 0.000000e+00 : f32
    %cst_2 = arith.constant 6.000000e+00 : f32
    %3 = vector.broadcast %cst_1 : f32 to vector<1x2048xf32>
    %4 = arith.maximumf %3, %2 : vector<1x2048xf32>
    %5 = vector.broadcast %cst_2 : f32 to vector<1x2048xf32>
    %6 = arith.minimumf %5, %4 : vector<1x2048xf32>
    %cst_3 = arith.constant 0.166666672 : f32
    %7 = vector.broadcast %cst_3 : f32 to vector<1x2048xf32>
    %8 = arith.mulf %6, %7 : vector<1x2048xf32>
    %9 = arith.mulf %0, %8 : vector<1x2048xf32>
    %cst_4 = arith.constant -3.000000e+00 : f32
    %10 = vector.broadcast %cst_4 : f32 to vector<1x2048xf32>
    %11 = arith.cmpf ole, %0, %10 : vector<1x2048xf32>
    %cst_5 = arith.constant 0.000000e+00 : f32
    %12 = vector.broadcast %cst_5 : f32 to vector<1x2048xf32>
    %13 = arith.select %11, %12, %9 : vector<1x2048xi1>, vector<1x2048xf32>
    %c0_6 = arith.constant 0 : index
    %c0_7 = arith.constant 0 : index
    %14 = vector.load %arg2[%c0_6, %c0_7] : memref<1x2048xf32, #tpu.memory_space<vmem>>, vector<1x2048xf32>
    tpu.vector_store %arg2[%c0_6, %c0_7], %13 {strides = array<i32>} : memref<1x2048xf32, #tpu.memory_space<vmem>>, vector<1x2048xf32>,
    return
  }
  func.func @transform_0(%arg0: i32) -> (i32, i32) {
    %c0_i32 = arith.constant 0 : i32
    %c0_i32_0 = arith.constant 0 : i32
    return %arg0, %c0_i32 : i32, i32
  }
  func.func @transform_1(%arg0: i32) -> (i32, i32) {
    %c0_i32 = arith.constant 0 : i32
    %c0_i32_0 = arith.constant 0 : i32
    return %arg0, %c0_i32 : i32, i32
  }
}

</mosaic_0001>

<bundles_post_ra>
// kernel: tpu_custom_call.1
= control target key start
LH: loop header
LB: loop body
LE: loop exit
PB: predicated region body
PF: predicated region fallthrough
CT: control target
= control target key end

     0   :  { %6 = vsyncpa [#allocation3], 0  ;;  %s130_s0 = inlined_call_operand.hbm [shape: f32[1,2048], index: 0, kind: input, shape index: {}]   ;;  %s131_s1 = inlined_call_operand.hbm [shape: f32[1,2048], index: 1, kind: output, shape index: {}]  }
   0x1   :  { %7 = vsyncpa [#allocation4], 0  ;;  %s13_s8 = sshll.u32 %s130_s0, 4  ;;  %s112_s9 = smov [#allocation2]   ;;  %s14_s8 = int_to_ptr.hbm [resolvable:$true] %s13_s8 }
   0x2   :  { %s15_s10 = sshll.u32 %s112_s9, 4  ;;  %s16_s10 = int_to_ptr.vmem [resolvable:$true] %s15_s10 }
   0x3   :  { %18 = dma.hbm_to_vmem [thread:$0]  %s14_s8, 256, %s16_s10, [#allocation3]  }
   0x4   :  { %108 = dma.done.wait [#allocation3], 256  }
   0x5   :  { %109 = vsyncadd [#allocation3], 4294967040  ;;  %v23_v0 = vld [vmem:[#allocation2] sm:$0xff]  ;;  %v24_v1 = vld [vmem:[#allocation2 + $0x8] sm:$0xff]  ;;  %s113_s0 = smov [#allocation5]   ;;  %s48_s14 = sshll.u32 %s131_s1, 4  ;;  %s49_s14 = int_to_ptr.hbm [resolvable:$true] %s48_s14 }
   0x6   :  { %v25_v2 = vadd.f32 3.0, %v23_v0  ;;  %v26_v3 = vadd.f32 3.0, %v24_v1  ;;  %vm35_vm0 = vcmp.le.f32.partialorder %v23_v0, -3.0  ;;  %vm36_vm1 = vcmp.le.f32.partialorder %v24_v1, -3.0  ;;  %s46_s11 = sshll.u32 %s113_s0, 4  ;;  %s47_s11 = int_to_ptr.vmem [resolvable:$true] %s46_s11 }
   0x8   :  { %v27_v4 = vmax.f32 %v25_v2, 0.0  ;;  %v28_v5 = vmax.f32 %v26_v3, 0.0 }
   0xa   :  { %v29_v6 = vmin.f32 %v27_v4, 6.0  ;;  %v30_v7 = vmin.f32 %v28_v5, 6.0 }
   0xc   :  { %v31_v8 = vmul.f32 0.16666667, %v29_v6  ;;  %v32_v9 = vmul.f32 0.16666667, %v30_v7 }
   0xe   :  { %v33_v10 = vmul.f32 %v31_v8, %v23_v0  ;;  %v34_v11 = vmul.f32 %v32_v9, %v24_v1 }
  0x10   :  { %v37_v12 = vsel %vm35_vm0, 0.0, %v33_v10  ;;  %v38_v13 = vsel %vm36_vm1, 0.0, %v34_v11 }
  0x11   :  { %39 = vst [vmem:[#allocation5] sm:$0xff] %v37_v12 }
  0x12   :  { %40 = vst [vmem:[#allocation5 + $0x8] sm:$0xff] %v38_v13 }
  0x13   :  { %51 = dma.vmem_to_hbm [thread:$0]  %s47_s11, 256, %s49_s14, [#allocation4]  }
  0x14   :  { %110 = dma.done.wait [#allocation4], 256  }
  0x15   :  { %111 = vsyncadd [#allocation4], 4294967040 }
  0x16   :  { %56 = vsyncpa [#allocation3], 1 }
  0x17   :  { %57 = vsyncpa [#allocation4], 1 }

</bundles_post_ra>
